<compile_context>
chip_gen: v7x
topology: tpu7x:2x2x1
jax: 0.10.0
libtpu: 0.0.40
codegen_flags: <defaults>
</compile_context>

<pallas_src>
import functools

import numpy as np
import jax
import jax.numpy as jnp
from jax.experimental import pallas as pl
from jax.experimental.pallas import tpu as pltpu


# ----------------------------------------------------------------------------
# helpers
# ----------------------------------------------------------------------------
def _round_up(x, m):
    return ((x + m - 1) // m) * m


# Blocks in every kernel are ~0.5-1 MiB double-buffered, so 32 MiB is safe
# headroom on v5e / v6e / v7x alike.
_VMEM_LIMIT = 32 * 1024 * 1024


def ndc_projection(x=0.1, n=1.0, f=50.0):
    return np.array(
        [[n / x, 0, 0, 0],
         [0, n / -x, 0, 0],
         [0, 0, -(f + n) / (f - n), -(2 * f * n) / (f - n)],
         [0, 0, -1, 0]], dtype=np.float32)


def perspective_projection(focal, center):
    return np.array([focal, 0, center,
                     0, focal, center,
                     0, 0, 1], dtype=np.float32).reshape([3, 3]).transpose()


_SH_A = (np.pi, 2.0 * np.pi / np.sqrt(3.0), 2.0 * np.pi / np.sqrt(8.0))
_SH_C = (1.0 / np.sqrt(4.0 * np.pi),
         np.sqrt(3.0) / np.sqrt(4.0 * np.pi),
         3.0 * np.sqrt(5.0) / np.sqrt(12.0 * np.pi))


def _l2_normalize(x, axis=-1, eps=1e-12):
    # mirrors torch F.normalize(p=2): x / max(||x||, eps)
    norm = jnp.sqrt(jnp.sum(x * x, axis=axis, keepdims=True))
    return x / jnp.maximum(norm, eps)


# ----------------------------------------------------------------------------
# Pallas kernels
# ----------------------------------------------------------------------------
def _backbone_kernel(p_ref, wc_ref, bc_ref, o_ref, *, s_valid, inv_count,
                     need_mask):
    """Fused conv-as-matmul (bf16) + ReLU + global-average-pool.

    grid = (batch, spatial tiles).  The (1, 1, CMID) output block stays
    resident across the spatial ("arbitrary") axis and is used directly as the
    accumulator; the last spatial tile may be ragged and is masked.
    """
    s = pl.program_id(1)

    @pl.when(s == 0)
    def _():
        o_ref[...] = jnp.zeros_like(o_ref)

    y = jnp.dot(p_ref[0], wc_ref[...], preferred_element_type=jnp.float32)
    y = jnp.maximum(y + bc_ref[...], 0.0)
    if need_mask:
        tm = y.shape[0]
        row = s * tm + jax.lax.broadcasted_iota(jnp.int32, (tm, 1), 0)
        y = jnp.where(row < s_valid, y, 0.0)
    o_ref[...] += jnp.sum(y, axis=0, keepdims=True)[None]

    @pl.when(s == pl.num_programs(1) - 1)
    def _():
        o_ref[...] *= inv_count


def _shape_basis_kernel(c_ref, base_ref, mean_ref, o_ref):
    """face_shape tile = [id|exp]_coeff @ [id;exp]_base_tile + mean_shape_tile.

    Base streamed as bf16 (memory-bound), accumulation in f32 on the MXU.
    """
    o_ref[...] = (jnp.dot(c_ref[...], base_ref[...],
                          preferred_element_type=jnp.float32)
                  + mean_ref[...])


def _tex_sh_kernel(texc_ref, texb_ref, mtex_ref, norm_ref, gamma_ref,
                   tex_ref, col_ref):
    """Fused texture-basis matmul + SH lighting, flattened channel-planar.

    texb_ref : (3*80, TV) bf16  (rows ch*80..ch*80+79, 1/255 pre-folded)
    mtex_ref : (3, TV)    f32   (1/255 pre-folded)
    norm_ref : (3*B, TV)  f32   (rows comp*B + b)
    gamma_ref: (B, 27)    f32   (index = 3*k + ch)
    outputs  : (3*B, TV)  f32   (rows ch*B + b) — texture, color
    The vertex axis (TV, multiple of 128) is the lane axis; sublanes are packed
    (3*B rows per block instead of 3 separate (B, TV) planes).
    """
    a0, a1, a2 = _SH_A
    c0, c1, c2 = _SH_C
    B = gamma_ref.shape[0]
    kdim = texc_ref.shape[1]

    nx = norm_ref[0 * B:1 * B, :]
    ny = norm_ref[1 * B:2 * B, :]
    nz = norm_ref[2 * B:3 * B, :]
    ones = jnp.ones_like(nx)
    Y = (a0 * c0 * ones,
         -a1 * c1 * ny,
         a1 * c1 * nz,
         -a1 * c1 * nx,
         a2 * c2 * nx * ny,
         -a2 * c2 * ny * nz,
         (0.5 * a2 * c2 / np.sqrt(3.0)) * (3.0 * nz * nz - 1.0),
         -a2 * c2 * nx * nz,
         0.5 * a2 * c2 * (nx * nx - ny * ny))
    texc = texc_ref[...]                                        # (B, 80) bf16
    g = gamma_ref[...]                                          # (B, 27) f32
    for ch in range(3):
        base_ch = texb_ref[ch * kdim:(ch + 1) * kdim, :]        # (80, TV)
        t = (jnp.dot(texc, base_ch, preferred_element_type=jnp.float32)
             + mtex_ref[ch:ch + 1, :])                          # (B, TV)
        shading = Y[0] * g[:, ch:ch + 1]
        for k in range(1, 9):
            shading = shading + Y[k] * g[:, 3 * k + ch:3 * k + ch + 1]
        tex_ref[ch * B:(ch + 1) * B, :] = t
        col_ref[ch * B:(ch + 1) * B, :] = shading * t


# ----------------------------------------------------------------------------
# Pallas wrappers
# ----------------------------------------------------------------------------
def bfm_shape(idexp_coeff_bf16, idexp_base_bf16, mean_shape_pad, tn):
    """(B, 144) @ (144, 3N_pad) + mean, tiled over the padded 3N dimension."""
    B, kdim = idexp_coeff_bf16.shape
    d3p = idexp_base_bf16.shape[1]
    n_j = d3p // tn
    return pl.pallas_call(
        _shape_basis_kernel,
        out_shape=jax.ShapeDtypeStruct((B, d3p), jnp.float32),
        grid=(n_j,),
        in_specs=[
            pl.BlockSpec((B, kdim), lambda j: (0, 0)),
            pl.BlockSpec((kdim, tn), lambda j: (0, j)),
            pl.BlockSpec((1, tn), lambda j: (0, j)),
        ],
        out_specs=pl.BlockSpec((B, tn), lambda j: (0, j)),
        compiler_params=pltpu.CompilerParams(
            dimension_semantics=("parallel",),
            vmem_limit_bytes=_VMEM_LIMIT),
    )(idexp_coeff_bf16, idexp_base_bf16, mean_shape_pad)


def tex_sh_color(tex_coeff_bf16, tex_base_flat_bf16, mean_tex_flat, norm_flat,
                 gamma_flat, tv):
    """Fused texture basis + SH color, tiled over the padded vertex dimension.

    Returns (texture, color), both flattened channel-planar (3*B, N_pad) f32.
    """
    B, kdim = tex_coeff_bf16.shape
    n_pad = tex_base_flat_bf16.shape[1]
    n_j = n_pad // tv
    return pl.pallas_call(
        _tex_sh_kernel,
        out_shape=(jax.ShapeDtypeStruct((3 * B, n_pad), jnp.float32),
                   jax.ShapeDtypeStruct((3 * B, n_pad), jnp.float32)),
        grid=(n_j,),
        in_specs=[
            pl.BlockSpec((B, kdim), lambda j: (0, 0)),
            pl.BlockSpec((3 * kdim, tv), lambda j: (0, j)),
            pl.BlockSpec((3, tv), lambda j: (0, j)),
            pl.BlockSpec((3 * B, tv), lambda j: (0, j)),
            pl.BlockSpec((B, 27), lambda j: (0, 0)),
        ],
        out_specs=(pl.BlockSpec((3 * B, tv), lambda j: (0, j)),
                   pl.BlockSpec((3 * B, tv), lambda j: (0, j))),
        compiler_params=pltpu.CompilerParams(
            dimension_semantics=("parallel",),
            vmem_limit_bytes=_VMEM_LIMIT),
    )(tex_coeff_bf16, tex_base_flat_bf16, mean_tex_flat, norm_flat, gamma_flat)


# ----------------------------------------------------------------------------
# net_recon stand-in: fused (conv 3x3/s2 + ReLU + GAP) kernel + tiny XLA FC
# ----------------------------------------------------------------------------
class NetReconStandin:
    IN_CH = 3
    CMID = 128        # conv output channels (lane-dense)
    KPAD = 32         # im2col K = 3*3*3 = 27 padded to a sublane multiple
    NOUT = 257

    def __init__(self, key, block_rows=2048):
        # block_rows: spatial rows per grid step (big tile amortizes per-step
        # overhead; (tm, 32) bf16 block is only ~128 KiB).
        self.block_rows = block_rows
        k1, k2, k3, k4 = jax.random.split(key, 4)
        kdim = self.IN_CH * 9
        w_conv = 0.1 * jax.random.normal(k1, (kdim, self.CMID), jnp.float32)
        w_conv = jnp.pad(w_conv, ((0, self.KPAD - kdim), (0, 0)))
        self.w_conv = w_conv.astype(jnp.bfloat16)       # bf16 weight stream
        self.b_conv = 0.1 * jax.random.normal(k2, (1, self.CMID), jnp.float32)
        self.w_fc = 0.1 * jax.random.normal(k3, (self.CMID, self.NOUT),
                                            jnp.float32)
        self.b_fc = 0.05 * jax.random.normal(k4, (self.NOUT,), jnp.float32)

    def _im2col_3x3_s2(self, x):
        # x: (B, C, H, W), pad=1, stride=2 -> (B, Ho*Wo, KPAD) bf16.
        # The 27->32 K padding is folded into the concatenate (one zero column
        # group) so there is no extra full-tensor jnp.pad HBM pass, and the
        # whole patch stream is bf16 (halves the dominant HBM read).
        B, C, H, W = x.shape
        Ho, Wo = H // 2, W // 2
        xp = jnp.pad(x, ((0, 0), (0, 0), (1, 1), (1, 1))).astype(jnp.bfloat16)
        xp = jnp.transpose(xp, (0, 2, 3, 1))                    # (B, Hp, Wp, C)
        cols = [xp[:, ki:ki + 2 * Ho:2, kj:kj + 2 * Wo:2, :]
                for ki in range(3) for kj in range(3)]
        if self.KPAD > 9 * C:
            cols.append(jnp.zeros((B, Ho, Wo, self.KPAD - 9 * C),
                                  jnp.bfloat16))
        patches = jnp.concatenate(cols, axis=-1)                # (B, Ho, Wo, 32)
        return patches.reshape(B, Ho * Wo, self.KPAD), (B, Ho * Wo)

    def __call__(self, img):
        # TODO(synk): full ResNet-50 backbone not reproduced; this is a
        # deterministic conv(3x3/s2)+ReLU+GAP stand-in producing 257 coeffs.
        patches, (B, S) = self._im2col_3x3_s2(img)
        tm = min(self.block_rows, _round_up(S, 8))
        n_s = pl.cdiv(S, tm)
        pooled = pl.pallas_call(
            functools.partial(_backbone_kernel, s_valid=S,
                              inv_count=1.0 / float(S),
                              need_mask=(S % tm != 0)),
            out_shape=jax.ShapeDtypeStruct((B, 1, self.CMID), jnp.float32),
            grid=(B, n_s),
            in_specs=[
                pl.BlockSpec((1, tm, self.KPAD), lambda b, s: (b, s, 0)),
                pl.BlockSpec((self.KPAD, self.CMID), lambda b, s: (0, 0)),
                pl.BlockSpec((1, self.CMID), lambda b, s: (0, 0)),
            ],
            out_specs=pl.BlockSpec((1, 1, self.CMID), lambda b, s: (b, 0, 0)),
            compiler_params=pltpu.CompilerParams(
                dimension_semantics=("parallel", "arbitrary"),
                vmem_limit_bytes=_VMEM_LIMIT),
        )(patches, self.w_conv, self.b_conv)
        pooled = pooled[:, 0, :]                                # (B, CMID)
        # Tiny FC (B,128)@(128,257) hoisted out of the kernel: removes the
        # padded 128x384 f32 weight from VMEM and the M=1 MXU matmul per step.
        return pooled @ self.w_fc + self.b_fc                   # (B, 257)


# ----------------------------------------------------------------------------
# Parametric face model (synthetic deterministic BFM-style assets)
# ----------------------------------------------------------------------------
class SyntheticFaceModel:
    def __init__(self, key, n_ver=512, n_face=300,
                 camera_distance=10.0, focal=1015.0, center=112.0,
                 max_tn=2048, max_tv=1024):
        ks = jax.random.split(key, 8)
        self.n_ver = n_ver
        self.n_face = n_face
        d3 = 3 * n_ver

        # Tile sizes are fixed multiples of 128 and the tiled dims are padded
        # up to a multiple of the tile, so the Pallas grids never fall back to
        # a single full-extent block (critical at real BFM sizes where
        # 3N % 128 != 0: a single (144, 3N) bf16 block would not fit v7x VMEM).
        self.tn = min(max_tn, _round_up(d3, 128))
        self.d3_pad = _round_up(d3, self.tn)
        self.tv = min(max_tv, _round_up(n_ver, 128))
        self.n_ver_pad = _round_up(n_ver, self.tv)

        id_base_t = 0.01 * jax.random.normal(ks[0], (80, d3), jnp.float32)
        exp_base_t = 0.01 * jax.random.normal(ks[1], (64, d3), jnp.float32)
        # Pre-concatenated [id; exp] basis -> a single K=144 matmul, columns
        # zero-padded to d3_pad.  Stored bf16 (memory-bound), f32 accumulate.
        idexp = jnp.concatenate([id_base_t, exp_base_t], axis=0)
        idexp = jnp.pad(idexp, ((0, 0), (0, self.d3_pad - d3)))
        self.idexp_base = idexp.astype(jnp.bfloat16)            # (144, d3_pad)

        mean_shape = jax.random.normal(ks[3], (n_ver, 3), jnp.float32)
        mean_shape = mean_shape - jnp.mean(mean_shape, axis=0, keepdims=True)
        self.mean_shape = jnp.pad(mean_shape.reshape(1, d3),
                                  ((0, 0), (0, self.d3_pad - d3)))

        tex_base_t = 1.0 * jax.random.normal(ks[2], (80, d3), jnp.float32)
        # Flattened channel-planar (3*80, N_pad) with the 1/255 normalization
        # folded in at init (constant transform, no per-element VPU mul).
        tb = jnp.transpose(tex_base_t.reshape(80, n_ver, 3), (2, 0, 1))
        tb = tb.reshape(3 * 80, n_ver) * (1.0 / 255.0)
        tb = jnp.pad(tb, ((0, 0), (0, self.n_ver_pad - n_ver)))
        self.tex_base_flat = tb.astype(jnp.bfloat16)            # (240, N_pad)

        mean_tex = 127.5 + 20.0 * jax.random.normal(ks[4], (1, d3), jnp.float32)
        mt = jnp.transpose(mean_tex.reshape(n_ver, 3), (1, 0)) * (1.0 / 255.0)
        self.mean_tex_flat = jnp.pad(mt, ((0, 0),
                                          (0, self.n_ver_pad - n_ver)))  # (3, N_pad)

        self.face_buf = jax.random.randint(ks[5], (n_face, 3), 0, n_ver)
        self.point_buf = jax.random.randint(ks[6], (n_ver, 8), 0, n_face + 1)
        self.keypoints = jax.random.randint(ks[7], (68,), 0, n_ver)
        self.camera_distance = camera_distance
        self.persc_proj = jnp.asarray(perspective_projection(focal, center))
        self.init_lit = jnp.asarray(
            np.array([0.8, 0, 0, 0, 0, 0, 0, 0, 0], np.float32).reshape(1, 1, 9))

    # ---- coefficient split (B, 257) ----
    @staticmethod
    def split_coeff(coeffs):
        return {
            'id': coeffs[:, :80],
            'exp': coeffs[:, 80:144],
            'tex': coeffs[:, 144:224],
            'angle': coeffs[:, 224:227],
            'gamma': coeffs[:, 227:254],
            'trans': coeffs[:, 254:],
        }

    # ---- rotation (B,3) -> (B,3,3), returns (rot_z@rot_y@rot_x).T per batch ----
    @staticmethod
    def compute_rotation(angles):
        B = angles.shape[0]
        x, y, z = angles[:, 0], angles[:, 1], angles[:, 2]
        ones = jnp.ones_like(x)
        zeros = jnp.zeros_like(x)
        rot_x = jnp.stack([ones, zeros, zeros,
                           zeros, jnp.cos(x), -jnp.sin(x),
                           zeros, jnp.sin(x), jnp.cos(x)], axis=1).reshape(B, 3, 3)
        rot_y = jnp.stack([jnp.cos(y), zeros, jnp.sin(y),
                           zeros, ones, zeros,
                           -jnp.sin(y), zeros, jnp.cos(y)], axis=1).reshape(B, 3, 3)
        rot_z = jnp.stack([jnp.cos(z), -jnp.sin(z), zeros,
                           jnp.sin(z), jnp.cos(z), zeros,
                           zeros, zeros, ones], axis=1).reshape(B, 3, 3)
        rot = rot_z @ rot_y @ rot_x
        return jnp.transpose(rot, (0, 2, 1))

    def transform(self, face_shape, rot, trans):
        return jnp.einsum('bnk,bkj->bnj', face_shape, rot) + trans[:, None, :]

    def to_camera(self, face_shape):
        return face_shape.at[..., 2].set(self.camera_distance - face_shape[..., 2])

    def to_image(self, face_shape):
        face_proj = face_shape @ self.persc_proj
        return face_proj[..., :2] / face_proj[..., 2:]

    def get_landmarks(self, face_proj):
        return face_proj[:, self.keypoints]

    def compute_norm(self, face_shape):
        # gather-heavy: stays in JAX (no clean tiled-Pallas expression)
        fb = self.face_buf
        v1 = face_shape[:, fb[:, 0]]
        v2 = face_shape[:, fb[:, 1]]
        v3 = face_shape[:, fb[:, 2]]
        e1 = v1 - v2
        e2 = v2 - v3
        face_norm = jnp.cross(e1, e2)
        face_norm = _l2_normalize(face_norm, axis=-1)
        zeros = jnp.zeros((face_norm.shape[0], 1, 3), jnp.float32)
        face_norm = jnp.concatenate([face_norm, zeros], axis=1)
        vertex_norm = jnp.sum(face_norm[:, self.point_buf], axis=2)
        return _l2_normalize(vertex_norm, axis=-1)

    def compute_for_render(self, coeffs):
        coef = self.split_coeff(coeffs)
        B = coeffs.shape[0]
        N = self.n_ver

        # --- Pallas: fused [id|exp] BFM basis matmul, tiled over padded 3N ---
        idexp_c = coeffs[:, :144].astype(jnp.bfloat16)
        shape_flat = bfm_shape(idexp_c, self.idexp_base, self.mean_shape,
                               self.tn)
        face_shape = shape_flat[:, :3 * N].reshape(B, N, 3)

        rotation = self.compute_rotation(coef['angle'])
        face_shape_t = self.transform(face_shape, rotation, coef['trans'])

        face_range = jnp.concatenate(
            (jnp.min(face_shape, axis=1), jnp.max(face_shape, axis=1)), axis=0)
        face_range = jnp.concatenate((face_range, face_shape[0, ::500]), axis=0)

        face_vertex = self.to_camera(face_shape_t)
        face_proj = self.to_image(face_vertex)
        landmark = self.get_landmarks(face_proj)

        face_norm = self.compute_norm(face_shape)
        # Rotated normal produced directly in the flattened channel-planar
        # layout (row = component*B + b) the SH kernel consumes — avoids an
        # extra (B,N,3)<->(3,B,N) transpose HBM pass.
        norm_flat = jnp.einsum('bnk,bkc->cbn', face_norm,
                               rotation).reshape(3 * B, N)
        if self.n_ver_pad != N:
            norm_flat = jnp.pad(norm_flat,
                                ((0, 0), (0, self.n_ver_pad - N)))

        # --- Pallas: fused texture basis + SH color, lane-dense layout ---
        g = coef['gamma'].reshape(B, 3, 9) + self.init_lit
        g = jnp.transpose(g, (0, 2, 1)).reshape(B, 27)          # index = 3*k+ch
        tex_c = coef['tex'].astype(jnp.bfloat16)
        tex_flat, col_flat = tex_sh_color(
            tex_c, self.tex_base_flat, self.mean_tex_flat, norm_flat, g,
            self.tv)
        face_texture = jnp.transpose(tex_flat[:, :N].reshape(3, B, N),
                                     (1, 2, 0))                 # (B, N, 3)
        face_color = jnp.transpose(col_flat[:, :N].reshape(3, B, N),
                                   (1, 2, 0))                   # (B, N, 3)
        return face_vertex, face_texture, face_color, landmark, face_range


# ----------------------------------------------------------------------------
# MeshRenderer
# ----------------------------------------------------------------------------
class MeshRendererJAX:
    def __init__(self, rasterize_fov, znear=0.1, zfar=10.0, rasterize_size=224):
        x = np.tan(np.deg2rad(rasterize_fov * 0.5)) * znear
        ndc = ndc_projection(x=x, n=znear, f=zfar) @ np.diag(
            np.array([1.0, -1.0, -1.0, 1.0], np.float32))
        self.ndc_proj = jnp.asarray(ndc.astype(np.float32))
        self.rasterize_size = int(rasterize_size)

    def __call__(self, vertex, tri, feat=None):
        B, N, _ = vertex.shape
        v = jnp.concatenate([vertex, jnp.ones((B, N, 1), jnp.float32)], axis=-1)
        v = v.at[..., 1].multiply(-1.0)
        _vertex_ndc = v @ self.ndc_proj.T
        # TODO(synk): nvdiffrast rasterize/interpolate has no Pallas equivalent;
        # mask/depth/image are returned as correctly-shaped zeros.
        rsize = self.rasterize_size
        mask = jnp.zeros((B, 1, rsize, rsize), jnp.float32)
        depth = jnp.zeros((B, 1, rsize, rsize), jnp.float32)
        image = None
        if feat is not None:
            image = jnp.zeros((B, feat.shape[-1], rsize, rsize), jnp.float32)
        return mask, depth, image


# ----------------------------------------------------------------------------
# DeepFaceRecon (JAX / Pallas)
# ----------------------------------------------------------------------------
class DeepFaceReconPallas:
    def __init__(self, key, n_ver=512, n_face=300):
        k_net, k_face = jax.random.split(key)
        self.net_recon = NetReconStandin(k_net)
        focal, center = 1015.0, 112.0
        self.facemodel = SyntheticFaceModel(
            k_face, n_ver=n_ver, n_face=n_face,
            camera_distance=10.0, focal=focal, center=center)
        fov = 2 * np.arctan(center / focal) * 180 / np.pi
        self.renderer = MeshRendererJAX(rasterize_fov=fov, znear=5.0, zfar=15.0,
                                        rasterize_size=int(2 * center))

    def __call__(self, input_img):
        output_coeff = self.net_recon(input_img)                # (B, 257)
        (pred_vertex, pred_tex, pred_color,
         pred_lm, pred_range) = self.facemodel.compute_for_render(output_coeff)
        pred_mask, pred_depth, pred_face = self.renderer(
            pred_vertex, self.facemodel.face_buf, feat=pred_color)
        coeffs_dict = self.facemodel.split_coeff(output_coeff)
        return {
            'depth': pred_depth,
            'angle': coeffs_dict['angle'],
            'trans': coeffs_dict['trans'],
        }


# ----------------------------------------------------------------------------
if __name__ == "__main__":
    key = jax.random.PRNGKey(0)
    k_img, k_model = jax.random.split(key)
    B, C, H, W = 2, 3, 64, 64
    input_img = jax.random.normal(k_img, (B, C, H, W), dtype=jnp.float32)

    model = DeepFaceReconPallas(k_model, n_ver=512, n_face=300)
    forward = jax.jit(lambda img: model(img))
    out = forward(input_img)
    jax.block_until_ready(out)

    assert out['depth'].shape == (B, 1, 224, 224)
    assert out['angle'].shape == (B, 3)
    assert out['trans'].shape == (B, 3)
    assert all(bool(jnp.all(jnp.isfinite(v))) for v in out.values())
    print("KERNEL_OK")
</pallas_src>

<mosaic_0001>
module attributes {stable_mosaic.version = 11 : i64} {
  func.func @_backbone_kernel(%arg0: i32, %arg1: i32, %arg2: memref<1x1024x32xbf16, #tpu.memory_space<vmem>>, %arg3: memref<32x128xbf16, #tpu.memory_space<vmem>>, %arg4: memref<1x128xf32, #tpu.memory_space<vmem>>, %arg5: memref<1x1x128xf32, #tpu.memory_space<vmem>>) attributes {dimension_semantics = [#tpu.dimension_semantics<parallel>, #tpu.dimension_semantics<arbitrary>], iteration_bounds = array<i64: 2, 1>, scalar_prefetch = 0 : i64, scratch_operands = 0 : i64, tpu.core_type = #tpu.core_type<tc>, window_params = [{transform_indices = @transform_0, window_bounds = array<i64: 1, 1024, 32>}, {pipeline_mode = #tpu.pipeline_mode<synchronous>, transform_indices = @transform_1, window_bounds = array<i64: 32, 128>}, {pipeline_mode = #tpu.pipeline_mode<synchronous>, transform_indices = @transform_2, window_bounds = array<i64: 1, 128>}, {transform_indices = @transform_3, window_bounds = array<i64: 1, 1, 128>}]} {
    %c0_i32 = arith.constant 0 : i32
    %0 = arith.cmpi eq, %arg1, %c0_i32 : i32
    %1 = arith.extui %0 : i1 to i32
    %c0_i32_0 = arith.constant 0 : i32
    %2 = arith.cmpi ne, %1, %c0_i32_0 : i32
    scf.if %2 {
      %cst_17 = arith.constant 0.000000e+00 : f32
      %21 = vector.broadcast %cst_17 : f32 to vector<1x1x128xf32>
      %c0_18 = arith.constant 0 : index
      %c0_19 = arith.constant 0 : index
      %c0_20 = arith.constant 0 : index
      %22 = vector.load %arg5[%c0_18, %c0_19, %c0_20] : memref<1x1x128xf32, #tpu.memory_space<vmem>>, vector<1x1x128xf32>
      tpu.vector_store %arg5[%c0_18, %c0_19, %c0_20], %21 {strides = array<i32>} : memref<1x1x128xf32, #tpu.memory_space<vmem>>, vector<1x1x128xf32>,
    } else {
    }
    %c0 = arith.constant 0 : index
    %c0_1 = arith.constant 0 : index
    %c0_2 = arith.constant 0 : index
    %3 = vector.load %arg2[%c0, %c0_1, %c0_2] : memref<1x1024x32xbf16, #tpu.memory_space<vmem>>, vector<1x1024x32xbf16>
    %4 = vector.shape_cast %3 : vector<1x1024x32xbf16> to vector<1024x32xbf16>
    %c0_3 = arith.constant 0 : index
    %c0_4 = arith.constant 0 : index
    %5 = vector.load %arg3[%c0_3, %c0_4] : memref<32x128xbf16, #tpu.memory_space<vmem>>, vector<32x128xbf16>
    %cst = arith.constant dense<0.000000e+00> : vector<1024x128xf32>
    %6 = tpu.matmul %4, %5, %cst {dimension_numbers = #tpu.dot_dimension_numbers<[1], [0], [0], [1], [0, 0, 1, 1], [], []>} : vector<1024x32xbf16>, vector<32x128xbf16>, vector<1024x128xf32> -> vector<1024x128xf32>
    %c0_5 = arith.constant 0 : index
    %c0_6 = arith.constant 0 : index
    %7 = vector.load %arg4[%c0_5, %c0_6] : memref<1x128xf32, #tpu.memory_space<vmem>>, vector<1x128xf32>
    %8 = vector.broadcast %7 : vector<1x128xf32> to vector<1024x128xf32>
    %9 = arith.addf %6, %8 : vector<1024x128xf32>
    %cst_7 = arith.constant 0.000000e+00 : f32
    %10 = vector.broadcast %cst_7 : f32 to vector<1024x128xf32>
    %11 = arith.maximumf %9, %10 : vector<1024x128xf32>
    %c0_8 = arith.constant 0 : index
    %c0_9 = arith.constant 0 : index
    %c0_10 = arith.constant 0 : index
    %12 = vector.load %arg5[%c0_8, %c0_9, %c0_10] : memref<1x1x128xf32, #tpu.memory_space<vmem>>, vector<1x1x128xf32>
    %cst_11 = arith.constant dense<0.000000e+00> : vector<128xf32>
    %13 = vector.multi_reduction <add>, %11, %cst_11 [0] : vector<1024x128xf32> to vector<128xf32>
    %14 = vector.shape_cast %13 : vector<128xf32> to vector<1x128xf32>
    %15 = vector.shape_cast %14 : vector<1x128xf32> to vector<1x1x128xf32>
    %16 = arith.addf %12, %15 : vector<1x1x128xf32>
    %c0_12 = arith.constant 0 : index
    %c0_13 = arith.constant 0 : index
    %c0_14 = arith.constant 0 : index
    %17 = vector.load %arg5[%c0_12, %c0_13, %c0_14] : memref<1x1x128xf32, #tpu.memory_space<vmem>>, vector<1x1x128xf32>
    tpu.vector_store %arg5[%c0_12, %c0_13, %c0_14], %16 {strides = array<i32>} : memref<1x1x128xf32, #tpu.memory_space<vmem>>, vector<1x1x128xf32>,
    %c0_i32_15 = arith.constant 0 : i32
    %18 = arith.cmpi eq, %arg1, %c0_i32_15 : i32
    %19 = arith.extui %18 : i1 to i32
    %c0_i32_16 = arith.constant 0 : i32
    %20 = arith.cmpi ne, %19, %c0_i32_16 : i32
    scf.if %20 {
      %c0_17 = arith.constant 0 : index
      %c0_18 = arith.constant 0 : index
      %c0_19 = arith.constant 0 : index
      %21 = vector.load %arg5[%c0_17, %c0_18, %c0_19] : memref<1x1x128xf32, #tpu.memory_space<vmem>>, vector<1x1x128xf32>
      %cst_20 = arith.constant 9.765625E-4 : f32
      %22 = vector.broadcast %cst_20 : f32 to vector<1x1x128xf32>
      %23 = arith.mulf %21, %22 : vector<1x1x128xf32>
      %c0_21 = arith.constant 0 : index
      %c0_22 = arith.constant 0 : index
      %c0_23 = arith.constant 0 : index
      %24 = vector.load %arg5[%c0_21, %c0_22, %c0_23] : memref<1x1x128xf32, #tpu.memory_space<vmem>>, vector<1x1x128xf32>
      tpu.vector_store %arg5[%c0_21, %c0_22, %c0_23], %23 {strides = array<i32>} : memref<1x1x128xf32, #tpu.memory_space<vmem>>, vector<1x1x128xf32>,
    } else {
    }
    return
  }
  func.func @transform_0(%arg0: i32, %arg1: i32) -> (i32, i32, i32) {
    %c0_i32 = arith.constant 0 : i32
    %c0_i32_0 = arith.constant 0 : i32
    return %arg0, %arg1, %c0_i32 : i32, i32, i32
  }
  func.func @transform_1(%arg0: i32, %arg1: i32) -> (i32, i32) {
    %c0_i32 = arith.constant 0 : i32
    %c0_i32_0 = arith.constant 0 : i32
    %c0_i32_1 = arith.constant 0 : i32
    return %c0_i32, %c0_i32_0 : i32, i32
  }
  func.func @transform_2(%arg0: i32, %arg1: i32) -> (i32, i32) {
    %c0_i32 = arith.constant 0 : i32
    %c0_i32_0 = arith.constant 0 : i32
    %c0_i32_1 = arith.constant 0 : i32
    return %c0_i32, %c0_i32_0 : i32, i32
  }
  func.func @transform_3(%arg0: i32, %arg1: i32) -> (i32, i32, i32) {
    %c0_i32 = arith.constant 0 : i32
    %c0_i32_0 = arith.constant 0 : i32
    %c0_i32_1 = arith.constant 0 : i32
    return %arg0, %c0_i32, %c0_i32_0 : i32, i32, i32
  }
}

</mosaic_0001>

<bundles_post_ra>
// kernel: _lambda_.1
= control target key start
LH: loop header
LB: loop body
LE: loop exit
PB: predicated region body
PF: predicated region fallthrough
CT: control target
= control target key end

     0   :  { %s2220_s12 = smov 0   ;;  %s2222_s13 = smov 0   ;;  %s2725_s0 = inlined_call_operand.vmem [shape: bf16[2,1024,32], index: 0, kind: input, shape index: {}]   ;;  %s2726_s1 = inlined_call_operand.vmem [shape: bf16[32,128], index: 1, kind: input, shape index: {}]   ;;  %s2727_s2 = inlined_call_operand.vmem [shape: f32[1,128], index: 2, kind: input, shape index: {}]   ;;  %s2728_s3 = inlined_call_operand.vmem [shape: f32[2,1,128], index: 3, kind: output, shape index: {}]  }
   0x1   :  { %s2224_s14 = smov 0  }
   0x2 LB: > { %s25_s15 = sadd.s32 1, %s2193_s13  ;;  %p1745_p0 = scmp.ge.s32.totalorder %s2197_s14, 1  ;;  %s2197_s14 = sphi %s2224_s14, %s13_s14   ;;  %s2193_s13 = sphi %s2222_s13, %s2738_s13   ;;  %s2189_s12 = sphi %s2220_s12, %s2737_s12  }
   0x3   : > { %p27_p1 = scmp.ge.s32.totalorder %s25_s15, 2  ;;  %p156_p2 = scmp.lt.s32.totalorder %s2197_s14, 3 }
   0x5   : > { %s2740_s15 = smov (%p27_p1, %s25_s15), 0  ;;  %p157_p3 = pnand %p1745_p0, %p156_p2 }
   0x7   : > { %160 = sbr.rel (%p157_p3) target bundleno = 521 (0x209), region = 32 }
   0xe   : > { %v2109_v0 = vld [vmem:[%s2726_s1] sm:$0xff]   ;;  %p183_p4 = scmp.lt.s32.totalorder %s2189_s12, 1  ;;  %v2110_v1 = vld [vmem:[%s2726_s1 + $0x8] sm:$0xff]   ;;  %vm672_vm0 = vcmask 261120  }
   0xf   : > { %1948 = vmatprep.subr.bf16.mxu0 %v2109_v0  ;;  %2080 = vmatprep.subr.bf16.mxu1 %v2109_v0 }
  0x10   : > { %s2742_s12 = smov (!%p183_p4, %s2189_s12), 1  ;;  %1949 = vmatpush3.bf16.msra.mxu0 %v2109_v0  ;;  %2082 = vmatpush3.bf16.msra.mxu1 %v2109_v0 }
  0x11   : > { %1950 = vmatprep.subr.bf16.mxu0 %v2110_v1  ;;  %s1881_s20 = sshll.u32 %s2742_s12, 9  ;;  %2081 = vmatprep.subr.bf16.mxu1 %v2110_v1  ;;  %s2551_s28 = scalar_lea.vmem %s2728_s3, %s2742_s12 }
  0x12   : > { %s2250_s23 = scalar_lea.vmem %s2725_s0, %s1881_s20 }
  0x13   : > { %v2111_v2 = vld [vmem:[%s2250_s23] sm:$0xff]   ;;  %v2112_v3 = vld [vmem:[%s2250_s23 + $0x8] sm:$0xff]   ;;  %v2113_v4 = vld [vmem:[%s2250_s23 + $0x10] sm:$0xff]  }
  0x14   : > { %1951 = vmatpush3.bf16.msra.mxu0 %v2110_v1  ;;  %2083 = vmatpush3.bf16.msra.mxu1 %v2110_v1  ;;  %v2114_v5 = vld [vmem:[%s2250_s23 + $0x18] sm:$0xff]   ;;  %v2115_v6 = vld [vmem:[%s2250_s23 + $0x20] sm:$0xff]   ;;  %v2116_v7 = vld [vmem:[%s2250_s23 + $0x28] sm:$0xff]  }
  0x15   : > { %1952 = vmatprep.mubr.msk.bf16.mxu0 %vm672_vm0, %v2111_v2  ;;  %v2117_v8 = vld [vmem:[%s2250_s23 + $0x30] sm:$0xff]   ;;  %v2118_v9 = vld [vmem:[%s2250_s23 + $0x38] sm:$0xff]   ;;  %v2119_v10 = vld [vmem:[%s2250_s23 + $0x40] sm:$0xff]  }
  0x16   : > { %v2120_v11 = vld [vmem:[%s2250_s23 + $0x48] sm:$0xff]   ;;  %v2121_v12 = vld [vmem:[%s2250_s23 + $0x50] sm:$0xff]   ;;  %v2143_v13 = vld [vmem:[%s2250_s23 + $0x100] sm:$0xff]  }
  0x17   : > { %1953 = vmatmul.mubr.msk.bf16.vlgmr.msra.gmra.mrb[0].mxu0 %vm672_vm0, %v2112_v3  ;;  %v2144_v14 = vld [vmem:[%s2250_s23 + $0x108] sm:$0xff]   ;;  %2016 = vmatprep.mubr.msk.bf16.mxu1 %vm672_vm0, %v2143_v13  ;;  %v2145_v15 = vld [vmem:[%s2250_s23 + $0x110] sm:$0xff]   ;;  %v2122_v16 = vld [vmem:[%s2250_s23 + $0x58] sm:$0xff]  }
  0x18   : > { %1956 = vmatprep.mubr.msk.bf16.mxu0 %vm672_vm0, %v2113_v4  ;;  %2017 = vmatmul.mubr.msk.bf16.vlgmr.msra.gmra.mrb[0].mxu1 %vm672_vm0, %v2144_v14  ;;  %v2146_v17 = vld [vmem:[%s2250_s23 + $0x118] sm:$0xff]   ;;  %v2147_v18 = vld [vmem:[%s2250_s23 + $0x120] sm:$0xff]   ;;  %v2124_v20 = vld [vmem:[%s2250_s23 + $0x68] sm:$0xff]  }
  0x19   : > { %2020 = vmatprep.mubr.msk.bf16.mxu1 %vm672_vm0, %v2145_v15  ;;  %v2123_v19 = vld [vmem:[%s2250_s23 + $0x60] sm:$0xff]   ;;  %v2148_v21 = vld [vmem:[%s2250_s23 + $0x128] sm:$0xff]   ;;  %v2149_v22 = vld [vmem:[%s2250_s23 + $0x130] sm:$0xff]  }
  0x1a   : > { %v2125_v23 = vld [vmem:[%s2250_s23 + $0x70] sm:$0xff]   ;;  %v2150_v24 = vld [vmem:[%s2250_s23 + $0x138] sm:$0xff]   ;;  %v2151_v26 = vld [vmem:[%s2250_s23 + $0x140] sm:$0xff]  }
  0x1b   : > { %v2126_v25 = vld [vmem:[%s2250_s23 + $0x78] sm:$0xff]   ;;  %v2127_v27 = vld [vmem:[%s2250_s23 + $0x80] sm:$0xff]   ;;  %v2152_v28 = vld [vmem:[%s2250_s23 + $0x148] sm:$0xff]  }
  0x1c   : > { %v2128_v29 = vld [vmem:[%s2250_s23 + $0x88] sm:$0xff]   ;;  %v2153_v30 = vld [vmem:[%s2250_s23 + $0x150] sm:$0xff]   ;;  %v2154_v32 = vld [vmem:[%s2250_s23 + $0x158] sm:$0xff]  }
  0x1d   : > { %v2129_v31 = vld [vmem:[%s2250_s23 + $0x90] sm:$0xff]   ;;  %v2130_v33 = vld [vmem:[%s2250_s23 + $0x98] sm:$0xff]   ;;  %v2155_v34 = vld [vmem:[%s2250_s23 + $0x160] sm:$0xff]  }
  0x1e   : > { %v2131_v35 = vld [vmem:[%s2250_s23 + $0xa0] sm:$0xff]   ;;  %v2156_v36 = vld [vmem:[%s2250_s23 + $0x168] sm:$0xff]   ;;  %v2157_v38 = vld [vmem:[%s2250_s23 + $0x170] sm:$0xff]  }
  0x1f   : > { %1957 = vmatmul.mubr.msk.bf16.gmra.mrb[4].mxu0 %vm672_vm0, %v2114_v5  ;;  %v2132_v37 = vld [vmem:[%s2250_s23 + $0xa8] sm:$0xff]   ;;  %v2133_v39 = vld [vmem:[%s2250_s23 + $0xb0] sm:$0xff]   ;;  %v2158_v40 = vld [vmem:[%s2250_s23 + $0x178] sm:$0xff]  }
  0x20   : > { %1960 = vmatprep.mubr.msk.bf16.mxu0 %vm672_vm0, %v2115_v6  ;;  %2021 = vmatmul.mubr.msk.bf16.gmra.mrb[4].mxu1 %vm672_vm0, %v2146_v17  ;;  %v2134_v41 = vld [vmem:[%s2250_s23 + $0xb8] sm:$0xff]   ;;  %v2159_v42 = vld [vmem:[%s2250_s23 + $0x180] sm:$0xff]   ;;  %v2160_v44 = vld [vmem:[%s2250_s23 + $0x188] sm:$0xff]  }
  0x21   : > { %2024 = vmatprep.mubr.msk.bf16.mxu1 %vm672_vm0, %v2147_v18  ;;  %v2135_v43 = vld [vmem:[%s2250_s23 + $0xc0] sm:$0xff]   ;;  %v2136_v45 = vld [vmem:[%s2250_s23 + $0xc8] sm:$0xff]   ;;  %v2161_v46 = vld [vmem:[%s2250_s23 + $0x190] sm:$0xff]  }
  0x22   : > { %v2137_v47 = vld [vmem:[%s2250_s23 + $0xd0] sm:$0xff]   ;;  %v2162_v48 = vld [vmem:[%s2250_s23 + $0x198] sm:$0xff]   ;;  %v2163_v50 = vld [vmem:[%s2250_s23 + $0x1a0] sm:$0xff]  }
  0x23   : > { %v2138_v49 = vld [vmem:[%s2250_s23 + $0xd8] sm:$0xff]   ;;  %v2139_v51 = vld [vmem:[%s2250_s23 + $0xe0] sm:$0xff]   ;;  %v2164_v52 = vld [vmem:[%s2250_s23 + $0x1a8] sm:$0xff]  }
  0x24   : > { %v2140_v53 = vld [vmem:[%s2250_s23 + $0xe8] sm:$0xff]   ;;  %v2165_v54 = vld [vmem:[%s2250_s23 + $0x1b0] sm:$0xff]   ;;  %v2166_v56 = vld [vmem:[%s2250_s23 + $0x1b8] sm:$0xff]  }
  0x25   : > { %v2141_v55 = vld [vmem:[%s2250_s23 + $0xf0] sm:$0xff]   ;;  %v2142_v57 = vld [vmem:[%s2250_s23 + $0xf8] sm:$0xff]   ;;  %v2167_v58 = vld [vmem:[%s2250_s23 + $0x1c0] sm:$0xff]  }
  0x26   : > { %v2168_v59 = vld [vmem:[%s2250_s23 + $0x1c8] sm:$0xff]   ;;  %v2169_v60 = vld [vmem:[%s2250_s23 + $0x1d0] sm:$0xff]   ;;  %v2170_v61 = vld [vmem:[%s2250_s23 + $0x1d8] sm:$0xff]  }
  0x27   : > { %1961 = vmatmul.mubr.msk.bf16.gmra.mrb[8].mxu0 %vm672_vm0, %v2116_v7  ;;  %v2171_v62 = vld [vmem:[%s2250_s23 + $0x1e0] sm:$0xff]   ;;  %v2172_v63 = vld [vmem:[%s2250_s23 + $0x1e8] sm:$0xff]   ;;  %v2173_v0 = vld [vmem:[%s2250_s23 + $0x1f0] sm:$0xff]  }
  0x28   : > { %1964 = vmatprep.mubr.msk.bf16.mxu0 %vm672_vm0, %v2117_v8  ;;  %2025 = vmatmul.mubr.msk.bf16.gmra.mrb[8].mxu1 %vm672_vm0, %v2148_v21  ;;  %v2174_v1 = vld [vmem:[%s2250_s23 + $0x1f8] sm:$0xff]   ;;  %v2383_v2 = vld [vmem:[%s2727_s2] ss:$0 sm:$0xff] }
  0x29   : > { %2028 = vmatprep.mubr.msk.bf16.mxu1 %vm672_vm0, %v2149_v22 }
  0x2f   : > { %1965 = vmatmul.mubr.msk.bf16.gmra.mrb[12].mxu0 %vm672_vm0, %v2118_v9 }
  0x30   : > { %1968 = vmatprep.mubr.msk.bf16.mxu0 %vm672_vm0, %v2119_v10  ;;  %2029 = vmatmul.mubr.msk.bf16.gmra.mrb[12].mxu1 %vm672_vm0, %v2150_v24 }
  0x31   : > { %2032 = vmatprep.mubr.msk.bf16.mxu1 %vm672_vm0, %v2151_v26 }
  0x37   : > { %1969 = vmatmul.mubr.msk.bf16.gmra.mrb[16].mxu0 %vm672_vm0, %v2120_v11 }
  0x38   : > { %1972 = vmatprep.mubr.msk.bf16.mxu0 %vm672_vm0, %v2121_v12  ;;  %2033 = vmatmul.mubr.msk.bf16.gmra.mrb[16].mxu1 %vm672_vm0, %v2152_v28 }
  0x39   : > { %2036 = vmatprep.mubr.msk.bf16.mxu1 %vm672_vm0, %v2153_v30 }
  0x3f   : > { %1973 = vmatmul.mubr.msk.bf16.gmra.mrb[20].mxu0 %vm672_vm0, %v2122_v16 }
  0x40   : > { %1976 = vmatprep.mubr.msk.bf16.mxu0 %vm672_vm0, %v2123_v19  ;;  %2037 = vmatmul.mubr.msk.bf16.gmra.mrb[20].mxu1 %vm672_vm0, %v2154_v32 }
  0x41   : > { %2040 = vmatprep.mubr.msk.bf16.mxu1 %vm672_vm0, %v2155_v34 }
  0x47   : > { %1977 = vmatmul.mubr.msk.bf16.gmra.mrb[24].mxu0 %vm672_vm0, %v2124_v20 }
  0x48   : > { %1980 = vmatprep.mubr.msk.bf16.mxu0 %vm672_vm0, %v2125_v23  ;;  %2041 = vmatmul.mubr.msk.bf16.gmra.mrb[24].mxu1 %vm672_vm0, %v2156_v36 }
  0x49   : > { %2044 = vmatprep.mubr.msk.bf16.mxu1 %vm672_vm0, %v2157_v38 }
  0x4f   : > { %1981 = vmatmul.mubr.msk.bf16.gmra.mrb[28].mxu0 %vm672_vm0, %v2126_v25 }
  0x50   : > { %1984 = vmatprep.mubr.msk.bf16.mxu0 %vm672_vm0, %v2127_v27  ;;  %2045 = vmatmul.mubr.msk.bf16.gmra.mrb[28].mxu1 %vm672_vm0, %v2158_v40 }
  0x51   : > { %2048 = vmatprep.mubr.msk.bf16.mxu1 %vm672_vm0, %v2159_v42 }
  0x57   : > { %1985 = vmatmul.mubr.msk.bf16.gmra.mrb[32].mxu0 %vm672_vm0, %v2128_v29 }
  0x58   : > { %1988 = vmatprep.mubr.msk.bf16.mxu0 %vm672_vm0, %v2129_v31  ;;  %2049 = vmatmul.mubr.msk.bf16.gmra.mrb[32].mxu1 %vm672_vm0, %v2160_v44 }
  0x59   : > { %2052 = vmatprep.mubr.msk.bf16.mxu1 %vm672_vm0, %v2161_v46 }
  0x5f   : > { %1989 = vmatmul.mubr.msk.bf16.gmra.mrb[36].mxu0 %vm672_vm0, %v2130_v33 }
  0x60   : > { %1992 = vmatprep.mubr.msk.bf16.mxu0 %vm672_vm0, %v2131_v35  ;;  %2053 = vmatmul.mubr.msk.bf16.gmra.mrb[36].mxu1 %vm672_vm0, %v2162_v48 }
  0x61   : > { %2056 = vmatprep.mubr.msk.bf16.mxu1 %vm672_vm0, %v2163_v50 }
  0x67   : > { %1993 = vmatmul.mubr.msk.bf16.gmra.mrb[40].mxu0 %vm672_vm0, %v2132_v37 }
  0x68   : > { %1996 = vmatprep.mubr.msk.bf16.mxu0 %vm672_vm0, %v2133_v39  ;;  %2057 = vmatmul.mubr.msk.bf16.gmra.mrb[40].mxu1 %vm672_vm0, %v2164_v52 }
  0x69   : > { %2060 = vmatprep.mubr.msk.bf16.mxu1 %vm672_vm0, %v2165_v54 }
  0x6f   : > { %1997 = vmatmul.mubr.msk.bf16.gmra.mrb[44].mxu0 %vm672_vm0, %v2134_v41 }
  0x70   : > { %2000 = vmatprep.mubr.msk.bf16.mxu0 %vm672_vm0, %v2135_v43  ;;  %2061 = vmatmul.mubr.msk.bf16.gmra.mrb[44].mxu1 %vm672_vm0, %v2166_v56 }
  0x71   : > { %2064 = vmatprep.mubr.msk.bf16.mxu1 %vm672_vm0, %v2167_v58 }
  0x77   : > { %2001 = vmatmul.mubr.msk.bf16.gmra.mrb[48].mxu0 %vm672_vm0, %v2136_v45 }
  0x78   : > { %2004 = vmatprep.mubr.msk.bf16.mxu0 %vm672_vm0, %v2137_v47  ;;  %2065 = vmatmul.mubr.msk.bf16.gmra.mrb[48].mxu1 %vm672_vm0, %v2168_v59 }
  0x79   : > { %2068 = vmatprep.mubr.msk.bf16.mxu1 %vm672_vm0, %v2169_v60 }
  0x7f   : > { %2005 = vmatmul.mubr.msk.bf16.gmra.mrb[52].mxu0 %vm672_vm0, %v2138_v49 }
  0x80   : > { %2008 = vmatprep.mubr.msk.bf16.mxu0 %vm672_vm0, %v2139_v51  ;;  %2069 = vmatmul.mubr.msk.bf16.gmra.mrb[52].mxu1 %vm672_vm0, %v2170_v61 }
  0x81   : > { %2072 = vmatprep.mubr.msk.bf16.mxu1 %vm672_vm0, %v2171_v62 }
  0x87   : > { %2009 = vmatmul.mubr.msk.bf16.gmra.mrb[56].mxu0 %vm672_vm0, %v2140_v53 }
  0x88   : > { %2012 = vmatprep.mubr.msk.bf16.mxu0 %vm672_vm0, %v2141_v55  ;;  %2073 = vmatmul.mubr.msk.bf16.gmra.mrb[56].mxu1 %vm672_vm0, %v2172_v63 }
  0x89   : > { %2076 = vmatprep.mubr.msk.bf16.mxu1 %vm672_vm0, %v2173_v0 }
  0x8f   : > { %2013 = vmatmul.mubr.msk.bf16.gmra.mrb[60].mxu0 %vm672_vm0, %v2142_v57 }
  0x90   : > { %2077 = vmatmul.mubr.msk.bf16.gmra.mrb[60].mxu1 %vm672_vm0, %v2174_v1 }
  0xea   : > { %v1954_v3 = vpop.f32.mrb[0].mxu0 }
  0xeb   : > { %v899_v4 = vpop.f32.mrb[1].mxu0  ;;  %v908_v8 = vadd.f32 %v1954_v3, %v2383_v2  ;;  %v2401_v61 = vpop.f32.mrb[0].mxu1 }
  0xec   : > { %v900_v5 = vadd.f32 %v2383_v2, %v899_v4  ;;  %v1955_v6 = vpop.f32.mrb[2].mxu0  ;;  %v2403_v1 = vpop.f32.mrb[1].mxu1 }
  0xed   : > { %v902_v7 = vpop.f32.mrb[3].mxu0  ;;  %v911_v11 = vadd.f32 %v1955_v6, %v2383_v2  ;;  %v1412_v13 = vmax.f32 %v908_v8, 0.0  ;;  %v2405_v4 = vpop.f32.mrb[2].mxu1 }
  0xee   : > { %v903_v9 = vadd.f32 %v2383_v2, %v902_v7  ;;  %v1410_v10 = vmax.f32 %v900_v5, 0.0 }
  0xef   : > { %v1413_v17 = vmax.f32 %v911_v11, 0.0 }
  0xf0   : > { %v1411_v12 = vmax.f32 %v903_v9, 0.0  ;;  %v2408_v9 = vpop.f32.mrb[3].mxu1 }
  0xf2   : > { %v1539_v14 = vadd.f32 %v1411_v12, %v1410_v10  ;;  %v1958_v15 = vpop.f32.mrb[4].mxu0 }
  0xf3   : > { %v915_v16 = vpop.f32.mrb[5].mxu0  ;;  %v924_v23 = vadd.f32 %v1958_v15, %v2383_v2 }
  0xf4   : > { %v1540_v18 = vadd.f32 %v1539_v14, %v1412_v13  ;;  %v916_v19 = vadd.f32 %v2383_v2, %v915_v16  ;;  %v1959_v20 = vpop.f32.mrb[6].mxu0 }
  0xf5   : > { %v918_v21 = vpop.f32.mrb[7].mxu0  ;;  %v927_v27 = vadd.f32 %v1959_v20, %v2383_v2  ;;  %v1416_v29 = vmax.f32 %v924_v23, 0.0 }
  0xf6   : > { %v1541_v22 = vadd.f32 %v1540_v18, %v1413_v17  ;;  %v1414_v24 = vmax.f32 %v916_v19, 0.0  ;;  %v919_v25 = vadd.f32 %v2383_v2, %v918_v21  ;;  %v2413_v18 = vpop.f32.mrb[4].mxu1 }
  0xf7   : > { %v1417_v33 = vmax.f32 %v927_v27, 0.0 }
  0xf8   : > { %v1542_v26 = vadd.f32 %v1541_v22, %v1414_v24  ;;  %v1415_v28 = vmax.f32 %v919_v25, 0.0  ;;  %v2415_v22 = vpop.f32.mrb[5].mxu1 }
  0xf9   : > { %v2417_v24 = vpop.f32.mrb[6].mxu1 }
  0xfa   : > { %v1543_v30 = vadd.f32 %v1542_v26, %v1415_v28  ;;  %v1962_v31 = vpop.f32.mrb[8].mxu0 }
  0xfb   : > { %v931_v32 = vpop.f32.mrb[9].mxu0  ;;  %v940_v39 = vadd.f32 %v1962_v31, %v2383_v2 }
  0xfc   : > { %v1544_v34 = vadd.f32 %v1543_v30, %v1416_v29  ;;  %v932_v35 = vadd.f32 %v2383_v2, %v931_v32  ;;  %v1963_v36 = vpop.f32.mrb[10].mxu0  ;;  %v2420_v29 = vpop.f32.mrb[7].mxu1 }
  0xfd   : > { %v934_v37 = vpop.f32.mrb[11].mxu0  ;;  %v943_v43 = vadd.f32 %v1963_v36, %v2383_v2  ;;  %v1420_v45 = vmax.f32 %v940_v39, 0.0 }
  0xfe   : > { %v1545_v38 = vadd.f32 %v1544_v34, %v1417_v33  ;;  %v1418_v40 = vmax.f32 %v932_v35, 0.0  ;;  %v935_v41 = vadd.f32 %v2383_v2, %v934_v37 }
  0xff   : > { %v1421_v49 = vmax.f32 %v943_v43, 0.0 }
 0x100   : > { %v1546_v42 = vadd.f32 %v1545_v38, %v1418_v40  ;;  %v1419_v44 = vmax.f32 %v935_v41, 0.0  ;;  %v2425_v38 = vpop.f32.mrb[8].mxu1 }
 0x102   : > { %v1547_v46 = vadd.f32 %v1546_v42, %v1419_v44  ;;  %v1966_v47 = vpop.f32.mrb[12].mxu0  ;;  %v2427_v42 = vpop.f32.mrb[9].mxu1 }
 0x103   : > { %v947_v48 = vpop.f32.mrb[13].mxu0  ;;  %v956_v55 = vadd.f32 %v1966_v47, %v2383_v2  ;;  %v2429_v44 = vpop.f32.mrb[10].mxu1 }
 0x104   : > { %v1548_v50 = vadd.f32 %v1547_v46, %v1420_v45  ;;  %v948_v51 = vadd.f32 %v2383_v2, %v947_v48  ;;  %v1967_v52 = vpop.f32.mrb[14].mxu0 }
 0x105   : > { %v950_v53 = vpop.f32.mrb[15].mxu0  ;;  %v959_v59 = vadd.f32 %v1967_v52, %v2383_v2  ;;  %v1424_v62 = vmax.f32 %v956_v55, 0.0 }
 0x106   : > { %v1549_v54 = vadd.f32 %v1548_v50, %v1421_v49  ;;  %v1422_v56 = vmax.f32 %v948_v51, 0.0  ;;  %v951_v57 = vadd.f32 %v2383_v2, %v950_v53  ;;  %v2432_v49 = vpop.f32.mrb[11].mxu1 }
 0x107   : > { %v1425_v5 = vmax.f32 %v959_v59, 0.0 }
 0x108   : > { %v1550_v58 = vadd.f32 %v1549_v54, %v1422_v56  ;;  %v1423_v60 = vmax.f32 %v951_v57, 0.0 }
 0x10a   : > { %v1551_v63 = vadd.f32 %v1550_v58, %v1423_v60  ;;  %v1970_v0 = vpop.f32.mrb[16].mxu0  ;;  %v2437_v58 = vpop.f32.mrb[12].mxu1 }
 0x10b   : > { %v963_v3 = vpop.f32.mrb[17].mxu0  ;;  %v972_v12 = vadd.f32 %v1970_v0, %v2383_v2 }
 0x10c   : > { %v1552_v6 = vadd.f32 %v1551_v63, %v1424_v62  ;;  %v964_v7 = vadd.f32 %v2383_v2, %v963_v3  ;;  %v1971_v8 = vpop.f32.mrb[18].mxu0  ;;  %v2439_v63 = vpop.f32.mrb[13].mxu1 }
 0x10d   : > { %v966_v10 = vpop.f32.mrb[19].mxu0  ;;  %v975_v16 = vadd.f32 %v1971_v8, %v2383_v2  ;;  %v1428_v19 = vmax.f32 %v972_v12, 0.0  ;;  %v2441_v3 = vpop.f32.mrb[14].mxu1 }
 0x10e   : > { %v1553_v11 = vadd.f32 %v1552_v6, %v1425_v5  ;;  %v1426_v13 = vmax.f32 %v964_v7, 0.0  ;;  %v967_v14 = vadd.f32 %v2383_v2, %v966_v10  ;;  %v2444_v10 = vpop.f32.mrb[15].mxu1 }
 0x10f   : > { %v1429_v25 = vmax.f32 %v975_v16, 0.0 }
 0x110   : > { %v1554_v15 = vadd.f32 %v1553_v11, %v1426_v13  ;;  %v1427_v17 = vmax.f32 %v967_v14, 0.0 }
 0x112   : > { %v1555_v20 = vadd.f32 %v1554_v15, %v1427_v17  ;;  %v1974_v21 = vpop.f32.mrb[20].mxu0 }
 0x113   : > { %v979_v23 = vpop.f32.mrb[21].mxu0  ;;  %v988_v32 = vadd.f32 %v1974_v21, %v2383_v2 }
 0x114   : > { %v1556_v26 = vadd.f32 %v1555_v20, %v1428_v19  ;;  %v980_v27 = vadd.f32 %v2383_v2, %v979_v23  ;;  %v1975_v28 = vpop.f32.mrb[22].mxu0  ;;  %v2449_v20 = vpop.f32.mrb[16].mxu1 }
 0x115   : > { %v982_v30 = vpop.f32.mrb[23].mxu0  ;;  %v991_v36 = vadd.f32 %v1975_v28, %v2383_v2  ;;  %v1432_v39 = vmax.f32 %v988_v32, 0.0 }
 0x116   : > { %v1557_v31 = vadd.f32 %v1556_v26, %v1429_v25  ;;  %v1430_v33 = vmax.f32 %v980_v27, 0.0  ;;  %v983_v34 = vadd.f32 %v2383_v2, %v982_v30  ;;  %v2451_v26 = vpop.f32.mrb[17].mxu1 }
 0x117   : > { %v1433_v45 = vmax.f32 %v991_v36, 0.0  ;;  %v2453_v28 = vpop.f32.mrb[18].mxu1 }
 0x118   : > { %v1558_v35 = vadd.f32 %v1557_v31, %v1430_v33  ;;  %v1431_v37 = vmax.f32 %v983_v34, 0.0  ;;  %v2456_v34 = vpop.f32.mrb[19].mxu1 }
 0x11a   : > { %v1559_v40 = vadd.f32 %v1558_v35, %v1431_v37  ;;  %v1978_v41 = vpop.f32.mrb[24].mxu0 }
 0x11b   : > { %v995_v43 = vpop.f32.mrb[25].mxu0  ;;  %v1004_v52 = vadd.f32 %v1978_v41, %v2383_v2 }
 0x11c   : > { %v1560_v46 = vadd.f32 %v1559_v40, %v1432_v39  ;;  %v996_v47 = vadd.f32 %v2383_v2, %v995_v43  ;;  %v1979_v48 = vpop.f32.mrb[26].mxu0 }
 0x11d   : > { %v998_v50 = vpop.f32.mrb[27].mxu0  ;;  %v1007_v56 = vadd.f32 %v1979_v48, %v2383_v2  ;;  %v1436_v59 = vmax.f32 %v1004_v52, 0.0 }
 0x11e   : > { %v1561_v51 = vadd.f32 %v1560_v46, %v1433_v45  ;;  %v1434_v53 = vmax.f32 %v996_v47, 0.0  ;;  %v999_v54 = vadd.f32 %v2383_v2, %v998_v50  ;;  %v2461_v46 = vpop.f32.mrb[20].mxu1 }
 0x11f   : > { %v1437_v5 = vmax.f32 %v1007_v56, 0.0 }
 0x120   : > { %v1562_v55 = vadd.f32 %v1561_v51, %v1434_v53  ;;  %v1435_v57 = vmax.f32 %v999_v54, 0.0  ;;  %v2463_v51 = vpop.f32.mrb[21].mxu1 }
 0x121   : > { %v2465_v53 = vpop.f32.mrb[22].mxu1 }
 0x122   : > { %v1563_v60 = vadd.f32 %v1562_v55, %v1435_v57  ;;  %v1982_v62 = vpop.f32.mrb[28].mxu0 }
 0x123   : > { %v1011_v0 = vpop.f32.mrb[29].mxu0  ;;  %v1020_v13 = vadd.f32 %v1982_v62, %v2383_v2 }
 0x124   : > { %v1564_v6 = vadd.f32 %v1563_v60, %v1436_v59  ;;  %v1012_v7 = vadd.f32 %v2383_v2, %v1011_v0  ;;  %v1983_v8 = vpop.f32.mrb[30].mxu0  ;;  %v2468_v59 = vpop.f32.mrb[23].mxu1 }
 0x125   : > { %v1014_v11 = vpop.f32.mrb[31].mxu0  ;;  %v1023_v17 = vadd.f32 %v1983_v8, %v2383_v2  ;;  %v1440_v21 = vmax.f32 %v1020_v13, 0.0 }
 0x126   : > { %v1565_v12 = vadd.f32 %v1564_v6, %v1437_v5  ;;  %v1438_v14 = vmax.f32 %v1012_v7, 0.0  ;;  %v1015_v15 = vadd.f32 %v2383_v2, %v1014_v11 }
 0x127   : > { %v1441_v30 = vmax.f32 %v1023_v17, 0.0 }
 0x128   : > { %v1566_v16 = vadd.f32 %v1565_v12, %v1438_v14  ;;  %v1439_v19 = vmax.f32 %v1015_v15, 0.0  ;;  %v2473_v12 = vpop.f32.mrb[24].mxu1 }
 0x12a   : > { %v1567_v23 = vadd.f32 %v1566_v16, %v1439_v19  ;;  %v1986_v25 = vpop.f32.mrb[32].mxu0  ;;  %v2475_v16 = vpop.f32.mrb[25].mxu1 }
 0x12b   : > { %v1027_v27 = vpop.f32.mrb[33].mxu0  ;;  %v1036_v37 = vadd.f32 %v1986_v25, %v2383_v2  ;;  %v2477_v19 = vpop.f32.mrb[26].mxu1 }
 0x12c   : > { %v1568_v31 = vadd.f32 %v1567_v23, %v1440_v21  ;;  %v1028_v32 = vadd.f32 %v2383_v2, %v1027_v27  ;;  %v1987_v33 = vpop.f32.mrb[34].mxu0 }
 0x12d   : > { %v1030_v35 = vpop.f32.mrb[35].mxu0  ;;  %v1039_v43 = vadd.f32 %v1987_v33, %v2383_v2  ;;  %v1444_v47 = vmax.f32 %v1036_v37, 0.0 }
 0x12e   : > { %v1569_v36 = vadd.f32 %v1568_v31, %v1441_v30  ;;  %v1442_v39 = vmax.f32 %v1028_v32, 0.0  ;;  %v1031_v40 = vadd.f32 %v2383_v2, %v1030_v35  ;;  %v2480_v30 = vpop.f32.mrb[27].mxu1 }
 0x12f   : > { %v1445_v54 = vmax.f32 %v1039_v43, 0.0 }
 0x130   : > { %v1570_v41 = vadd.f32 %v1569_v36, %v1442_v39  ;;  %v1443_v45 = vmax.f32 %v1031_v40, 0.0 }
 0x132   : > { %v1571_v48 = vadd.f32 %v1570_v41, %v1443_v45  ;;  %v1990_v50 = vpop.f32.mrb[36].mxu0  ;;  %v2485_v41 = vpop.f32.mrb[28].mxu1 }
 0x133   : > { %v1043_v52 = vpop.f32.mrb[37].mxu0  ;;  %v1052_v0 = vadd.f32 %v1990_v50, %v2383_v2 }
 0x134   : > { %v1572_v55 = vadd.f32 %v1571_v48, %v1444_v47  ;;  %v1044_v56 = vadd.f32 %v2383_v2, %v1043_v52  ;;  %v1991_v57 = vpop.f32.mrb[38].mxu0  ;;  %v2487_v48 = vpop.f32.mrb[29].mxu1 }
 0x135   : > { %v1046_v60 = vpop.f32.mrb[39].mxu0  ;;  %v1055_v8 = vadd.f32 %v1991_v57, %v2383_v2  ;;  %v1448_v13 = vmax.f32 %v1052_v0, 0.0  ;;  %v2489_v52 = vpop.f32.mrb[30].mxu1 }
 0x136   : > { %v1573_v62 = vadd.f32 %v1572_v55, %v1445_v54  ;;  %v1446_v5 = vmax.f32 %v1044_v56, 0.0  ;;  %v1047_v6 = vadd.f32 %v2383_v2, %v1046_v60  ;;  %v2492_v60 = vpop.f32.mrb[31].mxu1 }
 0x137   : > { %v1449_v21 = vmax.f32 %v1055_v8, 0.0 }
 0x138   : > { %v1574_v7 = vadd.f32 %v1573_v62, %v1446_v5  ;;  %v1447_v11 = vmax.f32 %v1047_v6, 0.0 }
 0x13a   : > { %v1575_v14 = vadd.f32 %v1574_v7, %v1447_v11  ;;  %v1994_v15 = vpop.f32.mrb[40].mxu0 }
 0x13b   : > { %v1059_v17 = vpop.f32.mrb[41].mxu0  ;;  %v1068_v33 = vadd.f32 %v1994_v15, %v2383_v2 }
 0x13c   : > { %v1576_v23 = vadd.f32 %v1575_v14, %v1448_v13  ;;  %v1060_v25 = vadd.f32 %v2383_v2, %v1059_v17  ;;  %v1995_v27 = vpop.f32.mrb[42].mxu0  ;;  %v2497_v14 = vpop.f32.mrb[32].mxu1 }
 0x13d   : > { %v1062_v31 = vpop.f32.mrb[43].mxu0  ;;  %v1071_v39 = vadd.f32 %v1995_v27, %v2383_v2  ;;  %v1452_v43 = vmax.f32 %v1068_v33, 0.0 }
 0x13e   : > { %v1577_v32 = vadd.f32 %v1576_v23, %v1449_v21  ;;  %v1450_v35 = vmax.f32 %v1060_v25, 0.0  ;;  %v1063_v36 = vadd.f32 %v2383_v2, %v1062_v31  ;;  %v2499_v23 = vpop.f32.mrb[33].mxu1 }
 0x13f   : > { %v1453_v54 = vmax.f32 %v1071_v39, 0.0  ;;  %v2501_v27 = vpop.f32.mrb[34].mxu1 }
 0x140   : > { %v1578_v37 = vadd.f32 %v1577_v32, %v1450_v35  ;;  %v1451_v40 = vmax.f32 %v1063_v36, 0.0  ;;  %v2504_v36 = vpop.f32.mrb[35].mxu1 }
 0x142   : > { %v1579_v45 = vadd.f32 %v1578_v37, %v1451_v40  ;;  %v1998_v47 = vpop.f32.mrb[44].mxu0 }
 0x143   : > { %v1075_v50 = vpop.f32.mrb[45].mxu0  ;;  %v1084_v5 = vadd.f32 %v1998_v47, %v2383_v2 }
 0x144   : > { %v1580_v55 = vadd.f32 %v1579_v45, %v1452_v43  ;;  %v1076_v56 = vadd.f32 %v2383_v2, %v1075_v50  ;;  %v1999_v57 = vpop.f32.mrb[46].mxu0 }
 0x145   : > { %v1078_v62 = vpop.f32.mrb[47].mxu0  ;;  %v1087_v11 = vadd.f32 %v1999_v57, %v2383_v2  ;;  %v1456_v15 = vmax.f32 %v1084_v5, 0.0 }
 0x146   : > { %v1581_v0 = vadd.f32 %v1580_v55, %v1453_v54  ;;  %v1454_v6 = vmax.f32 %v1076_v56, 0.0  ;;  %v1079_v7 = vadd.f32 %v2383_v2, %v1078_v62  ;;  %v2509_v55 = vpop.f32.mrb[36].mxu1 }
 0x147   : > { %v1457_v31 = vmax.f32 %v1087_v11, 0.0 }
 0x148   : > { %v1582_v8 = vadd.f32 %v1581_v0, %v1454_v6  ;;  %v1455_v13 = vmax.f32 %v1079_v7, 0.0  ;;  %v2511_v0 = vpop.f32.mrb[37].mxu1 }
 0x149   : > { %v2513_v6 = vpop.f32.mrb[38].mxu1 }
 0x14a   : > { %v1583_v17 = vadd.f32 %v1582_v8, %v1455_v13  ;;  %v2002_v21 = vpop.f32.mrb[48].mxu0 }
 0x14b   : > { %v1091_v25 = vpop.f32.mrb[49].mxu0  ;;  %v1100_v40 = vadd.f32 %v2002_v21, %v2383_v2 }
 0x14c   : > { %v1584_v32 = vadd.f32 %v1583_v17, %v1456_v15  ;;  %v1092_v33 = vadd.f32 %v2383_v2, %v1091_v25  ;;  %v2003_v35 = vpop.f32.mrb[50].mxu0  ;;  %v2516_v15 = vpop.f32.mrb[39].mxu1 }
 0x14d   : > { %v1094_v37 = vpop.f32.mrb[51].mxu0  ;;  %v1103_v50 = vadd.f32 %v2003_v35, %v2383_v2  ;;  %v1460_v56 = vmax.f32 %v1100_v40, 0.0 }
 0x14e   : > { %v1585_v39 = vadd.f32 %v1584_v32, %v1457_v31  ;;  %v1458_v43 = vmax.f32 %v1092_v33, 0.0  ;;  %v1095_v45 = vadd.f32 %v2383_v2, %v1094_v37 }
 0x14f   : > { %v1461_v7 = vmax.f32 %v1103_v50, 0.0 }
 0x150   : > { %v1586_v47 = vadd.f32 %v1585_v39, %v1458_v43  ;;  %v1459_v54 = vmax.f32 %v1095_v45, 0.0  ;;  %v2521_v39 = vpop.f32.mrb[40].mxu1 }
 0x152   : > { %v1587_v57 = vadd.f32 %v1586_v47, %v1459_v54  ;;  %v2006_v62 = vpop.f32.mrb[52].mxu0  ;;  %v2523_v47 = vpop.f32.mrb[41].mxu1 }
 0x153   : > { %v1107_v5 = vpop.f32.mrb[53].mxu0  ;;  %v1116_v25 = vadd.f32 %v2006_v62, %v2383_v2  ;;  %v2525_v54 = vpop.f32.mrb[42].mxu1 }
 0x154   : > { %v1588_v8 = vadd.f32 %v1587_v57, %v1460_v56  ;;  %v1108_v11 = vadd.f32 %v2383_v2, %v1107_v5  ;;  %v2007_v13 = vpop.f32.mrb[54].mxu0  ;;  %2729 = vst [vmem:[#allocation2_spill] sm:$0xff] %v2525_v54 }
 0x155   : > { %v1110_v17 = vpop.f32.mrb[55].mxu0  ;;  %v1119_v35 = vadd.f32 %v2007_v13, %v2383_v2  ;;  %v1464_v40 = vmax.f32 %v1116_v25, 0.0 }
 0x156   : > { %v1589_v21 = vadd.f32 %v1588_v8, %v1461_v7  ;;  %v1462_v31 = vmax.f32 %v1108_v11, 0.0  ;;  %v1111_v32 = vadd.f32 %v2383_v2, %v1110_v17  ;;  %v2528_v7 = vpop.f32.mrb[43].mxu1 }
 0x157   : > { %v1465_v56 = vmax.f32 %v1119_v35, 0.0 }
 0x158   : > { %v1590_v33 = vadd.f32 %v1589_v21, %v1462_v31  ;;  %v1463_v37 = vmax.f32 %v1111_v32, 0.0 }
 0x15a   : > { %v1591_v43 = vadd.f32 %v1590_v33, %v1463_v37  ;;  %v2010_v45 = vpop.f32.mrb[56].mxu0  ;;  %v2533_v33 = vpop.f32.mrb[44].mxu1 }
 0x15b   : > { %v1123_v50 = vpop.f32.mrb[57].mxu0  ;;  %v1132_v13 = vadd.f32 %v2010_v45, %v2383_v2 }
 0x15c   : > { %v1592_v57 = vadd.f32 %v1591_v43, %v1464_v40  ;;  %v1124_v62 = vadd.f32 %v2383_v2, %v1123_v50  ;;  %v2011_v5 = vpop.f32.mrb[58].mxu0  ;;  %v2535_v43 = vpop.f32.mrb[45].mxu1 }
 0x15d   : > { %v1126_v8 = vpop.f32.mrb[59].mxu0  ;;  %v1135_v31 = vadd.f32 %v2011_v5, %v2383_v2  ;;  %v1468_v35 = vmax.f32 %v1132_v13, 0.0  ;;  %v2537_v54 = vpop.f32.mrb[46].mxu1 }
 0x15e   : > { %v1593_v11 = vadd.f32 %v1592_v57, %v1465_v56  ;;  %v1466_v17 = vmax.f32 %v1124_v62, 0.0  ;;  %v1127_v21 = vadd.f32 %v2383_v2, %v1126_v8  ;;  %2730 = vst [vmem:[#allocation3_spill] sm:$0xff] %v2537_v54  ;;  %v2540_v8 = vpop.f32.mrb[47].mxu1 }
 0x15f   : > { %v1469_v56 = vmax.f32 %v1135_v31, 0.0 }
 0x160   : > { %v1594_v25 = vadd.f32 %v1593_v11, %v1466_v17  ;;  %v1467_v32 = vmax.f32 %v1127_v21, 0.0 }
 0x162   : > { %v1595_v37 = vadd.f32 %v1594_v25, %v1467_v32  ;;  %v2014_v40 = vpop.f32.mrb[60].mxu0  ;;  %v1156_v25 = vadd.f32 %v2383_v2, %v2403_v1 }
 0x163   : > { %v1139_v50 = vpop.f32.mrb[61].mxu0  ;;  %v1148_v17 = vadd.f32 %v2014_v40, %v2383_v2 }
 0x164   : > { %v1596_v45 = vadd.f32 %v1595_v37, %v1468_v35  ;;  %v1140_v57 = vadd.f32 %v2383_v2, %v1139_v50  ;;  %v2015_v62 = vpop.f32.mrb[62].mxu0  ;;  %v2553_v35 = vpop.f32.mrb[48].mxu1  ;;  %v2199_v37 = vmov 0.0  }
 0x165   : > { %v1142_v5 = vpop.f32.mrb[63].mxu0  ;;  %v1151_v54 = vadd.f32 %v2015_v62, %v2383_v2  ;;  %2731 = vst [vmem:[#allocation4_spill] sm:$0xff] %v2553_v35  ;;  %200 = vst [vmem:[%s2551_s28] sm:$0x1] %v2199_v37  ;;  %v1472_v40 = vmax.f32 %v1148_v17, 0.0  ;;  %v1474_v62 = vmax.f32 %v1156_v25, 0.0  ;;  %v1167_v17 = vadd.f32 %v2405_v4, %v2383_v2 }
 0x166   : > { %v1597_v11 = vadd.f32 %v1596_v45, %v1469_v56  ;;  %v1470_v13 = vmax.f32 %v1140_v57, 0.0  ;;  %v1143_v21 = vadd.f32 %v2383_v2, %v1142_v5  ;;  %v2556_v56 = vpop.f32.mrb[49].mxu1  ;;  %v1159_v5 = vadd.f32 %v2383_v2, %v2408_v9 }
 0x167   : > { %v2558_v45 = vpop.f32.mrb[50].mxu1  ;;  %v1473_v1 = vmax.f32 %v1151_v54, 0.0  ;;  %v1180_v4 = vadd.f32 %v2413_v18, %v2383_v2 }
 0x168   : > { %v1598_v32 = vadd.f32 %v1597_v11, %v1470_v13  ;;  %v1471_v31 = vmax.f32 %v1143_v21, 0.0  ;;  %v2562_v11 = vpop.f32.mrb[51].mxu1  ;;  %v1164_v21 = vadd.f32 %v2401_v61, %v2383_v2  ;;  %v1175_v61 = vadd.f32 %v2383_v2, %v2420_v29 }
 0x169   : > { %v2570_v54 = vpop.f32.mrb[52].mxu1 }
 0x16a   : > { %v1599_v50 = vadd.f32 %v1598_v32, %v1471_v31  ;;  %v1475_v32 = vmax.f32 %v1159_v5, 0.0  ;;  %v1172_v31 = vadd.f32 %v2383_v2, %v2415_v22  ;;  %v1476_v25 = vmax.f32 %v1164_v21, 0.0 }
 0x16b   : > { %v1188_v21 = vadd.f32 %v2383_v2, %v2427_v42 }
 0x16c   : > { %v1600_v57 = vadd.f32 %v1599_v50, %v1472_v40  ;;  %v2572_v40 = vpop.f32.mrb[53].mxu1  ;;  %v1477_v50 = vmax.f32 %v1167_v17, 0.0 }
 0x16d   : > { %v2574_v9 = vpop.f32.mrb[54].mxu1  ;;  %v1482_v18 = vmax.f32 %v1188_v21, 0.0 }
 0x16e   : > { %v1601_v13 = vadd.f32 %v1600_v57, %v1473_v1  ;;  %2732 = vst [vmem:[#allocation5_spill] sm:$0xff] %v2574_v9  ;;  %v1478_v57 = vmax.f32 %v1172_v31, 0.0 }
 0x170   : > { %v1602_v35 = vadd.f32 %v1601_v13, %v1474_v62  ;;  %v2578_v62 = vpop.f32.mrb[55].mxu1  ;;  %v1479_v13 = vmax.f32 %v1175_v61, 0.0  ;;  %v1199_v61 = vadd.f32 %v2429_v44, %v2383_v2  ;;  %v1212_v44 = vadd.f32 %v2437_v58, %v2383_v2 }
 0x171   : > { %v2586_v17 = vpop.f32.mrb[56].mxu1  ;;  %v1228_v58 = vadd.f32 %v2449_v20, %v2383_v2  ;;  %v1244_v20 = vadd.f32 %v2461_v46, %v2383_v2  ;;  %v1260_v46 = vadd.f32 %v2473_v12, %v2383_v2  ;;  %v1276_v12 = vadd.f32 %v2485_v41, %v2383_v2 }
 0x172   : > { %v1603_v37 = vadd.f32 %v1602_v35, %v1475_v32  ;;  %v1183_v35 = vadd.f32 %v2417_v24, %v2383_v2  ;;  %v1480_v32 = vmax.f32 %v1180_v4, 0.0  ;;  %v1196_v24 = vadd.f32 %v2425_v38, %v2383_v2 }
 0x173   : > { %v1292_v41 = vadd.f32 %v2497_v14, %v2383_v2  ;;  %v1308_v14 = vadd.f32 %v2509_v55, %v2383_v2  ;;  %v1324_v55 = vadd.f32 %v2521_v39, %v2383_v2  ;;  %v1340_v39 = vadd.f32 %v2533_v33, %v2383_v2 }
 0x174   : > { %v1604_v1 = vadd.f32 %v1603_v37, %v1476_v25  ;;  %v2588_v25 = vpop.f32.mrb[57].mxu1  ;;  %v1481_v37 = vmax.f32 %v1183_v35, 0.0  ;;  %v1484_v35 = vmax.f32 %v1196_v24, 0.0 }
 0x175   : > { %v2590_v29 = vpop.f32.mrb[58].mxu1 }
 0x176   : > { %v1605_v22 = vadd.f32 %v1604_v1, %v1477_v50  ;;  %v1191_v50 = vadd.f32 %v2383_v2, %v2432_v49  ;;  %v2594_v1 = vpop.f32.mrb[59].mxu1 }
 0x178   : > { %v1606_v5 = vadd.f32 %v1605_v22, %v1478_v57  ;;  %v1483_v4 = vmax.f32 %v1191_v50, 0.0  ;;  %v1204_v22 = vadd.f32 %v2383_v2, %v2439_v63  ;;  %v1215_v50 = vadd.f32 %v2441_v3, %v2383_v2 }
 0x179   : > { %v1231_v3 = vadd.f32 %v2453_v28, %v2383_v2  ;;  %v1247_v28 = vadd.f32 %v2465_v53, %v2383_v2  ;;  %v1263_v53 = vadd.f32 %v2477_v19, %v2383_v2  ;;  %v1279_v19 = vadd.f32 %v2489_v52, %v2383_v2 }
 0x17a   : > { %v1607_v31 = vadd.f32 %v1606_v5, %v1479_v13  ;;  %v2602_v5 = vpop.f32.mrb[60].mxu1  ;;  %v1486_v38 = vmax.f32 %v1204_v22, 0.0  ;;  %v1295_v52 = vadd.f32 %v2501_v27, %v2383_v2  ;;  %v1311_v27 = vadd.f32 %v2513_v6, %v2383_v2 }
 0x17b   : > { %v2604_v21 = vpop.f32.mrb[61].mxu1 }
 0x17c   : > { %v1608_v9 = vadd.f32 %v1607_v31, %v1480_v32  ;;  %v2606_v49 = vpop.f32.mrb[62].mxu1  ;;  %v1485_v32 = vmax.f32 %v1199_v61, 0.0 }
 0x17e   : > { %v1609_v42 = vadd.f32 %v1608_v9, %v1481_v37  ;;  %v1207_v9 = vadd.f32 %v2383_v2, %v2444_v10  ;;  %v2610_v37 = vpop.f32.mrb[63].mxu1  ;;  %v1223_v10 = vadd.f32 %v2383_v2, %v2456_v34  ;;  %v1239_v34 = vadd.f32 %v2383_v2, %v2468_v59 }
 0x17f   : > { %v1255_v59 = vadd.f32 %v2383_v2, %v2480_v30  ;;  %v1271_v30 = vadd.f32 %v2383_v2, %v2492_v60  ;;  %v1287_v60 = vadd.f32 %v2383_v2, %v2504_v36  ;;  %v1303_v36 = vadd.f32 %v2383_v2, %v2516_v15 }
 0x180   : > { %v1610_v57 = vadd.f32 %v1609_v42, %v1482_v18  ;;  %v1487_v24 = vmax.f32 %v1207_v9, 0.0  ;;  %v1220_v42 = vadd.f32 %v2383_v2, %v2451_v26  ;;  %v1236_v26 = vadd.f32 %v2383_v2, %v2463_v51 }
 0x181   : > { %v1252_v51 = vadd.f32 %v2383_v2, %v2475_v16  ;;  %v1268_v16 = vadd.f32 %v2383_v2, %v2487_v48  ;;  %v1284_v48 = vadd.f32 %v2383_v2, %v2499_v23  ;;  %v1300_v23 = vadd.f32 %v2383_v2, %v2511_v0 }
 0x182   : > { %v1611_v13 = vadd.f32 %v1610_v57, %v1483_v4  ;;  %v1488_v57 = vmax.f32 %v1212_v44, 0.0  ;;  %v1489_v4 = vmax.f32 %v1215_v50, 0.0  ;;  %v1493_v44 = vmax.f32 %v1231_v3, 0.0 }
 0x183   : > { %v1316_v0 = vadd.f32 %v2383_v2, %v2523_v47  ;;  %v1319_v15 = vadd.f32 %v2383_v2, %v2528_v7  ;;  %v1332_v47 = vadd.f32 %v2383_v2, %v2535_v43  ;;  %v1335_v7 = vadd.f32 %v2383_v2, %v2540_v8 }
 0x184   : > { %v1612_v31 = vadd.f32 %v1611_v13, %v1484_v35  ;;  %v1490_v35 = vmax.f32 %v1220_v42, 0.0  ;;  %v1495_v42 = vmax.f32 %v1239_v34, 0.0  ;;  %v1348_v43 = vadd.f32 %v2383_v2, %v2556_v56 }
 0x185   : > { %v1351_v8 = vadd.f32 %v2383_v2, %v2562_v11  ;;  %v1364_v56 = vadd.f32 %v2383_v2, %v2572_v40  ;;  %v1367_v11 = vadd.f32 %v2383_v2, %v2578_v62  ;;  %v1380_v40 = vadd.f32 %v2383_v2, %v2588_v25 }
 0x186   : > { %v1613_v63 = vadd.f32 %v1612_v31, %v1485_v32  ;;  %v1491_v31 = vmax.f32 %v1223_v10, 0.0  ;;  %v1383_v62 = vadd.f32 %v2383_v2, %v2594_v1  ;;  %v1396_v25 = vadd.f32 %v2383_v2, %v2604_v21 }
 0x187   : > { %v1399_v1 = vadd.f32 %v2383_v2, %v2610_v37 }
 0x188   : > { %v1614_v18 = vadd.f32 %v1613_v63, %v1486_v38  ;;  %v1492_v38 = vmax.f32 %v1228_v58, 0.0 }
 0x189   : > { %v1535_v21 = vmax.f32 %v1399_v1, 0.0 }
 0x18a   : > { %v1615_v61 = vadd.f32 %v1614_v18, %v1487_v24  ;;  %v1494_v18 = vmax.f32 %v1236_v26, 0.0 }
 0x18c   : > { %v1616_v22 = vadd.f32 %v1615_v61, %v1488_v57  ;;  %v1496_v57 = vmax.f32 %v1244_v20, 0.0  ;;  %v1505_v20 = vmax.f32 %v1279_v19, 0.0  ;;  %v1518_v19 = vmax.f32 %v1332_v47, 0.0 }
 0x18d   : > { %v1534_v47 = vmax.f32 %v1396_v25, 0.0 }
 0x18e   : > { %v1617_v13 = vadd.f32 %v1616_v22, %v1489_v4  ;;  %v1497_v4 = vmax.f32 %v1247_v28, 0.0 }
 0x190   : > { %v1618_v32 = vadd.f32 %v1617_v13, %v1490_v35  ;;  %v1498_v35 = vmax.f32 %v1252_v51, 0.0  ;;  %v1499_v13 = vmax.f32 %v1255_v59, 0.0  ;;  %v1507_v51 = vmax.f32 %v1287_v60, 0.0 }
 0x192   : > { %v1619_v9 = vadd.f32 %v1618_v32, %v1491_v31  ;;  %v1500_v32 = vmax.f32 %v1260_v46, 0.0  ;;  %v1501_v31 = vmax.f32 %v1263_v53, 0.0 }
 0x194   : > { %v1620_v63 = vadd.f32 %v1619_v9, %v1492_v38  ;;  %v1502_v38 = vmax.f32 %v1268_v16, 0.0 }
 0x196   : > { %v1621_v50 = vadd.f32 %v1620_v63, %v1493_v44  ;;  %v1503_v63 = vmax.f32 %v1271_v30, 0.0  ;;  %v1516_v30 = vmax.f32 %v1324_v55, 0.0  ;;  %v1391_v55 = vadd.f32 %v2590_v29, %v2383_v2 }
 0x197   : > { %v1407_v29 = vadd.f32 %v2606_v49, %v2383_v2 }
 0x198   : > { %v1622_v24 = vadd.f32 %v1621_v50, %v1494_v18  ;;  %v1504_v18 = vmax.f32 %v1276_v12, 0.0 }
 0x19a   : > { %v1623_v61 = vadd.f32 %v1622_v24, %v1495_v42  ;;  %v1506_v24 = vmax.f32 %v1284_v48, 0.0 }
 0x19c   : > { %v1624_v22 = vadd.f32 %v1623_v61, %v1496_v57  ;;  %v1508_v57 = vmax.f32 %v1292_v41, 0.0 }
 0x19e   : > { %v1625_v10 = vadd.f32 %v1624_v22, %v1497_v4  ;;  %v1509_v4 = vmax.f32 %v1295_v52, 0.0 }
 0x1a0   : > { %v1626_v58 = vadd.f32 %v1625_v10, %v1498_v35  ;;  %v1510_v35 = vmax.f32 %v1300_v23, 0.0  ;;  %v1511_v10 = vmax.f32 %v1303_v36, 0.0  ;;  %v1359_v23 = vadd.f32 %v2558_v45, %v2383_v2 }
 0x1a1   : > { %v1526_v36 = vmax.f32 %v1364_v56, 0.0 }
 0x1a2   : > { %v1627_v3 = vadd.f32 %v1626_v58, %v1499_v13  ;;  %v1512_v58 = vmax.f32 %v1308_v14, 0.0  ;;  %v1513_v13 = vmax.f32 %v1311_v27, 0.0  ;;  %v1372_v14 = vadd.f32 %v2570_v54, %v2383_v2  ;;  %v2736_v27 = vld [vmem:[#allocation5_spill] sm:$0xff] }
 0x1a3   : > { %v1375_v45 = vadd.f32 %v2736_v27, %v2383_v2  ;;  %v1388_v54 = vadd.f32 %v2586_v17, %v2383_v2  ;;  %v1404_v17 = vadd.f32 %v2602_v5, %v2383_v2  ;;  %v1538_v5 = vld [vmem:[%s2551_s28] sm:$0x1] }
 0x1a4   : > { %v1628_v26 = vadd.f32 %v1627_v3, %v1500_v32  ;;  %v1514_v32 = vmax.f32 %v1316_v0, 0.0  ;;  %v1528_v0 = vmax.f32 %v1372_v14, 0.0 }
 0x1a6   : > { %v1629_v9 = vadd.f32 %v1628_v26, %v1501_v31  ;;  %v2733_v26 = vld [vmem:[#allocation2_spill] sm:$0xff] }
 0x1a7   : > { %v1327_v6 = vadd.f32 %v2733_v26, %v2383_v2 }
 0x1a8   : > { %v1630_v44 = vadd.f32 %v1629_v9, %v1502_v38  ;;  %v1515_v38 = vmax.f32 %v1319_v15, 0.0 }
 0x1a9   : > { %v1517_v9 = vmax.f32 %v1327_v6, 0.0  ;;  %v1533_v6 = vmax.f32 %v1391_v55, 0.0 }
 0x1aa   : > { %v1631_v34 = vadd.f32 %v1630_v44, %v1503_v63 }
 0x1ac   : > { %v1632_v50 = vadd.f32 %v1631_v34, %v1504_v18  ;;  %v2734_v18 = vld [vmem:[#allocation3_spill] sm:$0xff] }
 0x1ad   : > { %v1343_v34 = vadd.f32 %v2734_v18, %v2383_v2 }
 0x1ae   : > { %v1633_v28 = vadd.f32 %v1632_v50, %v1505_v20  ;;  %v1519_v20 = vmax.f32 %v1335_v7, 0.0  ;;  %v1520_v50 = vmax.f32 %v1340_v39, 0.0 }
 0x1af   : > { %v1521_v60 = vmax.f32 %v1343_v34, 0.0 }
 0x1b0   : > { %v1634_v42 = vadd.f32 %v1633_v28, %v1506_v24  ;;  %v1522_v28 = vmax.f32 %v1348_v43, 0.0 }
 0x1b2   : > { %v1635_v61 = vadd.f32 %v1634_v42, %v1507_v51  ;;  %v2735_v42 = vld [vmem:[#allocation4_spill] sm:$0xff] }
 0x1b3   : > { %v1356_v33 = vadd.f32 %v2735_v42, %v2383_v2 }
 0x1b4   : > { %v1636_v22 = vadd.f32 %v1635_v61, %v1508_v57  ;;  %v1523_v57 = vmax.f32 %v1351_v8, 0.0 }
 0x1b5   : > { %v1524_v61 = vmax.f32 %v1356_v33, 0.0 }
 0x1b6   : > { %v1637_v59 = vadd.f32 %v1636_v22, %v1509_v4  ;;  %v1525_v22 = vmax.f32 %v1359_v23, 0.0 }
 0x1b8   : > { %v1638_v46 = vadd.f32 %v1637_v59, %v1510_v35 }
 0x1ba   : > { %v1639_v53 = vadd.f32 %v1638_v46, %v1511_v10  ;;  %v1527_v10 = vmax.f32 %v1367_v11, 0.0 }
 0x1bc   : > { %v1640_v16 = vadd.f32 %v1639_v53, %v1512_v58  ;;  %v1529_v53 = vmax.f32 %v1375_v45, 0.0 }
 0x1be   : > { %v1641_v3 = vadd.f32 %v1640_v16, %v1513_v13  ;;  %v1530_v16 = vmax.f32 %v1380_v40, 0.0 }
 0x1c0   : > { %v1642_v31 = vadd.f32 %v1641_v3, %v1514_v32  ;;  %v1531_v3 = vmax.f32 %v1383_v62, 0.0 }
 0x1c2   : > { %v1643_v12 = vadd.f32 %v1642_v31, %v1515_v38  ;;  %v1532_v31 = vmax.f32 %v1388_v54, 0.0 }
 0x1c4   : > { %v1644_v44 = vadd.f32 %v1643_v12, %v1516_v30 }
 0x1c6   : > { %v1645_v63 = vadd.f32 %v1644_v44, %v1517_v9  ;;  %v1536_v9 = vmax.f32 %v1404_v17, 0.0 }
 0x1c8   : > { %v1646_v48 = vadd.f32 %v1645_v63, %v1518_v19  ;;  %v1537_v19 = vmax.f32 %v1407_v29, 0.0 }
 0x1ca   : > { %v1647_v24 = vadd.f32 %v1646_v48, %v1519_v20 }
 0x1cc   : > { %v1648_v41 = vadd.f32 %v1647_v24, %v1520_v50 }
 0x1ce   : > { %v1649_v52 = vadd.f32 %v1648_v41, %v1521_v60 }
 0x1d0   : > { %v1650_v51 = vadd.f32 %v1649_v52, %v1522_v28 }
 0x1d2   : > { %v1651_v4 = vadd.f32 %v1650_v51, %v1523_v57 }
 0x1d4   : > { %v1652_v35 = vadd.f32 %v1651_v4, %v1524_v61 }
 0x1d6   : > { %v1653_v59 = vadd.f32 %v1652_v35, %v1525_v22 }
 0x1d8   : > { %v1654_v46 = vadd.f32 %v1653_v59, %v1526_v36 }
 0x1da   : > { %v1655_v58 = vadd.f32 %v1654_v46, %v1527_v10 }
 0x1dc   : > { %v1656_v13 = vadd.f32 %v1655_v58, %v1528_v0 }
 0x1de   : > { %v1657_v32 = vadd.f32 %v1656_v13, %v1529_v53 }
 0x1e0   : > { %v1658_v15 = vadd.f32 %v1657_v32, %v1530_v16 }
 0x1e2   : > { %v1659_v26 = vadd.f32 %v1658_v15, %v1531_v3 }
 0x1e4   : > { %v1660_v38 = vadd.f32 %v1659_v26, %v1532_v31 }
 0x1e6   : > { %v1661_v30 = vadd.f32 %v1660_v38, %v1533_v6 }
 0x1e8   : > { %v1662_v12 = vadd.f32 %v1661_v30, %v1534_v47 }
 0x1ea   : > { %v1663_v44 = vadd.f32 %v1662_v12, %v1535_v21 }
 0x1ec   : > { %v1664_v7 = vadd.f32 %v1663_v44, %v1536_v9 }
 0x1ee   : > { %v1665_v39 = vadd.f32 %v1664_v7, %v1537_v19 }
 0x1f0   : > { %v1666_v63 = vrot.slane %v1665_v39, 4 }
 0x1f2   : > { %v1667_v37 = vadd.f32 %v1666_v63, %v1665_v39 }
 0x1f4   : > { %v1668_v48 = vrot.slane %v1667_v37, 2 }
 0x1f6   : > { %v1669_v18 = vadd.f32 %v1668_v48, %v1667_v37 }
 0x1f8   : > { %v1670_v34 = vrot.slane %v1669_v18, 1 }
 0x1fa   : > { %v1671_v20 = vadd.f32 %v1670_v34, %v1669_v18 }
 0x1fc   : > { %v1672_v43 = vadd.f32 %v1671_v20, %v1538_v5 }
 0x1fe   : > { %1673 = vst [vmem:[%s2551_s28] sm:$0x1] %v1672_v43 }
 0x205   : > { %v1677_v50 = vld [vmem:[%s2551_s28] sm:$0x1] }
 0x206   : > { %v1678_v24 = vmul.f32 0.0009765625, %v1677_v50 }
 0x208   : > { %1679 = vst [vmem:[%s2551_s28] sm:$0x1] %v1678_v24 }
 0x209 PF: > { %s13_s14 = sadd.s32 1, %s2197_s14   ;;  %s2737_s12 = smov %s2193_s13 }
 0x20a   : > { %p10_p5 = scmp.ge.s32.totalorder %s13_s14, 4   ;;  %s2738_s13 = smov %s2740_s15 }
 0x20c   :  { %12 = sbr.rel (!%p10_p5) target bundleno = 2 (0x2), region = 70 }

</bundles_post_ra>
